<compile_context>
chip_gen: v5e
topology: v5e:2x2
jax: 0.10.0
libtpu: 0.0.40
codegen_flags: <defaults>
</compile_context>

<pallas_src>
import inspect
import math
import functools

import jax
import jax.numpy as jnp
from jax import lax
from jax.experimental import pallas as pl
from jax.experimental.pallas import tpu as pltpu

NEG_INF = -1e20  # ParlAI neginf() for float32


def encoder_layer_kernel(
    x_ref, mbias_ref, mcol_ref,
    wqkv_ref, bqkv_ref, wo_ref,
    bo_ref, g1_ref, beta1_ref,
    w1t_ref, b1_ref, w2_ref, b2_ref,
    g2_ref, beta2_ref,
    out_ref, acc_ref, xbf_ref,
    *, head_dim, group_size, ffn_tile,
):
    hg = pl.program_id(1)
    dh = head_dim
    G = group_size
    Gd = G * dh

    @pl.when(hg == 0)
    def _init():
        acc_ref[...] = jnp.zeros_like(acc_ref)
        # cast x to bf16 once per batch row; reused by every head group.
        xbf_ref[...] = x_ref[...].astype(jnp.bfloat16)

    x_bf = xbf_ref[...]                       # (T, D) bf16
    mbias = mbias_ref[...]                    # (1, T) additive key-mask bias

    # ---- fused QKV projection for this head group: (T, D) @ (D, 3*G*dh) ----
    # packed as [Q_group | K_group | V_group] -> G*dh-wide (lane-aligned) slices.
    # 1/sqrt(dh) is already folded into the Q weights/bias.
    qkv = jnp.dot(x_bf, wqkv_ref[...],
                  preferred_element_type=jnp.float32) + bqkv_ref[...]
    q_bf = qkv[:, 0:Gd].astype(jnp.bfloat16)
    k_bf = qkv[:, Gd:2 * Gd].astype(jnp.bfloat16)
    v_bf = qkv[:, 2 * Gd:3 * Gd].astype(jnp.bfloat16)

    # ---- per-head attention inside the group (static, small G) ----
    ctx_parts = []
    for g in range(G):
        sl = slice(g * dh, (g + 1) * dh)
        # scores: q @ k^T via dot_general (no explicit transpose)
        s = lax.dot_general(q_bf[:, sl], k_bf[:, sl], (((1,), (1,)), ((), ())),
                            preferred_element_type=jnp.float32)     # (T, T)
        s = s + mbias                                                # mask pad keys
        m = jnp.max(s, axis=-1, keepdims=True)
        p = jnp.exp(s - m)                                           # unnormalized
        denom = jnp.sum(p, axis=-1, keepdims=True)
        ctx = jnp.dot(p.astype(jnp.bfloat16), v_bf[:, sl],
                      preferred_element_type=jnp.float32)            # (T, dh)
        # deferred softmax normalization: scale the (T, dh) context, not the
        # (T, T) probabilities; reciprocal runs on the EUP slot.
        ctx_parts.append(ctx * pl.reciprocal(denom, approx=True))
    ctx_grp = jnp.concatenate(ctx_parts, axis=-1) if G > 1 else ctx_parts[0]

    # full-depth (G*dh) contraction into the output-projection accumulator;
    # this fuses "concat heads then project" into the head-group reduction.
    acc_ref[...] += jnp.dot(ctx_grp.astype(jnp.bfloat16), wo_ref[...],
                            preferred_element_type=jnp.float32)      # (T, D)

    # ---- finalize on the last group: residual / LN1 / FFN / LN2 / mask ----
    @pl.when(hg == pl.num_programs(1) - 1)
    def _finalize():
        x = x_ref[...]
        attn = acc_ref[...] + bo_ref[...]
        x1 = x + attn
        mu1 = jnp.mean(x1, axis=-1, keepdims=True)
        var1 = jnp.mean((x1 - mu1) ** 2, axis=-1, keepdims=True)
        x1 = (x1 - mu1) * lax.rsqrt(var1 + 1e-5) * g1_ref[...] + beta1_ref[...]

        # FFN, chunked over the hidden dim with a fori_loop so live ranges stay
        # bounded.  w1 is passed transposed (F, D) so all dynamic weight slices
        # are on the leading (sublane) dim.  acc_ref / xbf_ref are reused as the
        # FFN accumulator / bf16 FFN input (attention values already consumed).
        xbf_ref[...] = x1.astype(jnp.bfloat16)
        acc_ref[...] = jnp.zeros_like(acc_ref)
        n_chunks = w1t_ref.shape[0] // ffn_tile

        def ffn_chunk(c, carry):
            off = pl.multiple_of(c * ffn_tile, ffn_tile)
            w1c = w1t_ref[pl.ds(off, ffn_tile), :]                    # (ft, D) bf16
            hid = lax.dot_general(xbf_ref[...], w1c, (((1,), (1,)), ((), ())),
                                  preferred_element_type=jnp.float32)  # (T, ft)
            hid = jnp.maximum(hid + b1_ref[c], 0.0)
            acc_ref[...] += jnp.dot(hid.astype(jnp.bfloat16),
                                    w2_ref[pl.ds(off, ffn_tile), :],
                                    preferred_element_type=jnp.float32)
            return carry

        lax.fori_loop(0, n_chunks, ffn_chunk, 0)

        x2 = x1 + acc_ref[...] + b2_ref[...]
        mu2 = jnp.mean(x2, axis=-1, keepdims=True)
        var2 = jnp.mean((x2 - mu2) ** 2, axis=-1, keepdims=True)
        x2 = (x2 - mu2) * lax.rsqrt(var2 + 1e-5) * g2_ref[...] + beta2_ref[...]

        # final mask multiply (mask.unsqueeze(-1)); column-layout mask is a tiny
        # separate input to avoid an in-kernel (1,T)->(T,1) relayout.
        out_ref[...] = x2 * mcol_ref[...]


def _pick_ffn_tile(ffn_dim, max_tile=512):
    """Largest divisor of ffn_dim that is <= max_tile (never falls back to full F)."""
    best = 1
    for t in range(1, min(ffn_dim, max_tile) + 1):
        if ffn_dim % t == 0:
            best = t
    return best


def _pick_head_group(n_heads, head_dim, target=256):
    """Heads per grid step so the ctx@Wo contraction ~ MXU depth (256 on v6e/v7x;
    use target=128 on v5e)."""
    g = max(1, min(n_heads, max(1, target // max(head_dim, 1))))
    while n_heads % g:
        g -= 1
    return g


def _supports_single_buffering():
    """Feature check (no exception-swallowing around pallas_call)."""
    try:
        return (hasattr(pl, "Buffered")
                and "pipeline_mode" in inspect.signature(pl.BlockSpec).parameters)
    except (TypeError, ValueError):
        return False


def _vmem_limit_bytes():
    """Generation-aware VMEM cap: ~75% of physical per-core VMEM (48 MiB on
    v7x's 64 MiB, 96 MiB on v5e/v6e's 128 MiB).  Never request 100%."""
    try:
        cap = pltpu.get_tpu_info().vmem_capacity_bytes
        return int(cap) * 3 // 4
    except Exception:
        return None  # hardware query unavailable -> keep the compiler default


def transformer_encoder_layer(x, mask, params, n_heads):
    B, T, D = x.shape
    dh = D // n_heads
    F = params["w1"].shape[1]
    G = _pick_head_group(n_heads, dh)
    HG = n_heads // G
    Gd = G * dh
    ffn_tile = _pick_ffn_tile(F)
    n_chunks = F // ffn_tile
    inv_scale = 1.0 / math.sqrt(dh)

    # ---- one-time parameter packing (plain XLA ops) ----
    def pack_w(w):                     # (D, D) -> (HG, D, G*dh), head-group major
        return w.reshape(D, HG, Gd).transpose(1, 0, 2)

    def pack_b(b):                     # (D,) -> (HG, 1, G*dh)
        return b.reshape(HG, 1, Gd)

    # [Q_group | K_group | V_group] layout; 1/sqrt(dh) folded into Q weight+bias.
    wqkv = jnp.concatenate(
        [pack_w(params["wq"] * inv_scale),
         pack_w(params["wk"]),
         pack_w(params["wv"])], axis=-1).astype(jnp.bfloat16)          # (HG, D, 3*Gd)
    bqkv = jnp.concatenate(
        [pack_b(params["bq"] * inv_scale),
         pack_b(params["bk"]),
         pack_b(params["bv"])], axis=-1)                               # (HG, 1, 3*Gd) f32
    wo_g = params["wo"].reshape(HG, Gd, D).astype(jnp.bfloat16)        # (HG, Gd, D)

    w1t = params["w1"].T.astype(jnp.bfloat16)                          # (F, D)
    b1c = params["b1"].reshape(n_chunks, 1, ffn_tile)                  # f32 chunks
    w2 = params["w2"].astype(jnp.bfloat16)                             # (F, D)

    def row2(a):                       # 1-D param -> (1, N) 2-D tile
        return a.reshape(1, -1)

    # additive key-mask bias (0 where valid, NEG_INF where pad) + output column mask
    mask_bias = jnp.where(mask == 0, NEG_INF, 0.0).astype(jnp.float32).reshape(B, 1, T)
    mask_col = mask.reshape(B, T, 1).astype(x.dtype)

    args = (x, mask_bias, mask_col, wqkv, bqkv, wo_g,
            row2(params["bo"]), row2(params["ln1_g"]), row2(params["ln1_b"]),
            w1t, b1c, w2, row2(params["b2"]),
            row2(params["ln2_g"]), row2(params["ln2_b"]))

    kernel = functools.partial(encoder_layer_kernel,
                               head_dim=dh, group_size=G, ffn_tile=ffn_tile)

    single_buffer = _supports_single_buffering()

    def const_spec(arr):
        # whole array, constant block index -> fetched once; single-buffer it
        # when supported (double buffering a never-changing block wastes VMEM).
        nd = arr.ndim
        kwargs = {}
        if single_buffer:
            kwargs["pipeline_mode"] = pl.Buffered(1)
        return pl.BlockSpec(arr.shape, lambda b, hg, _n=nd: (0,) * _n, **kwargs)

    sq = pl.Squeezed()
    in_specs = [
        pl.BlockSpec((sq, T, D), lambda b, hg: (b, 0, 0)),         # x
        pl.BlockSpec((sq, 1, T), lambda b, hg: (b, 0, 0)),         # additive key-mask bias
        pl.BlockSpec((sq, T, 1), lambda b, hg: (b, 0, 0)),         # output mask (col)
        pl.BlockSpec((sq, D, 3 * Gd), lambda b, hg: (hg, 0, 0)),   # fused QKV weights, group hg
        pl.BlockSpec((sq, 1, 3 * Gd), lambda b, hg: (hg, 0, 0)),   # fused QKV bias, group hg
        pl.BlockSpec((sq, Gd, D), lambda b, hg: (hg, 0, 0)),       # out-proj rows, group hg
    ] + [const_spec(a) for a in args[6:]]

    grid_spec = pltpu.PrefetchScalarGridSpec(
        num_scalar_prefetch=0,
        grid=(B, HG),
        in_specs=in_specs,
        out_specs=pl.BlockSpec((sq, T, D), lambda b, hg: (b, 0, 0)),
        scratch_shapes=[pltpu.VMEM((T, D), jnp.float32),    # attention / FFN accumulator
                        pltpu.VMEM((T, D), jnp.bfloat16)],  # bf16 copy of x / LN1 output
    )

    cp_kwargs = dict(dimension_semantics=("parallel", "arbitrary"))
    limit = _vmem_limit_bytes()
    if limit is not None:
        cp_kwargs["vmem_limit_bytes"] = limit

    return pl.pallas_call(
        kernel,
        out_shape=jax.ShapeDtypeStruct((B, T, D), x.dtype),
        grid_spec=grid_spec,
        compiler_params=pltpu.CompilerParams(**cp_kwargs),
    )(*args)


# ----------------- deterministic parameter init (mirrors __init__) -----------------
def init_params(key, dim, ffn_dim):
    ks = jax.random.split(key, 16)

    def xavier_normal(k, shape):           # q/k/v/out projections
        fan_in, fan_out = shape
        std = math.sqrt(2.0 / (fan_in + fan_out))
        return std * jax.random.normal(k, shape, jnp.float32)

    def xavier_uniform(k, shape):          # ffn lin1 / lin2
        fan_in, fan_out = shape
        lim = math.sqrt(6.0 / (fan_in + fan_out))
        return jax.random.uniform(k, shape, jnp.float32, -lim, lim)

    def bias_init(k, fan_in, n):           # nn.Linear default bias init
        lim = 1.0 / math.sqrt(fan_in)
        return jax.random.uniform(k, (n,), jnp.float32, -lim, lim)

    params = {
        # attention projections, stored as (in, out)
        "wq": xavier_normal(ks[0], (dim, dim)), "bq": bias_init(ks[1], dim, dim),
        "wk": xavier_normal(ks[2], (dim, dim)), "bk": bias_init(ks[3], dim, dim),
        "wv": xavier_normal(ks[4], (dim, dim)), "bv": bias_init(ks[5], dim, dim),
        "wo": xavier_normal(ks[6], (dim, dim)), "bo": bias_init(ks[7], dim, dim),
        # layer norms
        "ln1_g": jnp.ones((dim,), jnp.float32), "ln1_b": jnp.zeros((dim,), jnp.float32),
        "ln2_g": jnp.ones((dim,), jnp.float32), "ln2_b": jnp.zeros((dim,), jnp.float32),
        # ffn
        "w1": xavier_uniform(ks[8], (dim, ffn_dim)), "b1": bias_init(ks[9], dim, ffn_dim),
        "w2": xavier_uniform(ks[10], (ffn_dim, dim)), "b2": bias_init(ks[11], ffn_dim, dim),
    }
    return params


# ----------------- pure-JAX f32 reference (sanity check) -----------------
def reference_forward(x, mask, params, n_heads):
    B, T, D = x.shape
    dh = D // n_heads
    scale = math.sqrt(dh)

    def lin(z, w, b):
        return z @ w + b

    q = lin(x, params["wq"], params["bq"]).reshape(B, T, n_heads, dh).transpose(0, 2, 1, 3)
    k = lin(x, params["wk"], params["bk"]).reshape(B, T, n_heads, dh).transpose(0, 2, 1, 3)
    v = lin(x, params["wv"], params["bv"]).reshape(B, T, n_heads, dh).transpose(0, 2, 1, 3)
    s = jnp.einsum("bhqd,bhkd->bhqk", q / scale, k)
    s = jnp.where((mask == 0)[:, None, None, :], NEG_INF, s)
    p = jax.nn.softmax(s, axis=-1)
    attn = jnp.einsum("bhqk,bhkd->bhqd", p, v).transpose(0, 2, 1, 3).reshape(B, T, D)
    attn = lin(attn, params["wo"], params["bo"])

    def layernorm(z, g, b):
        mu = jnp.mean(z, axis=-1, keepdims=True)
        var = jnp.mean((z - mu) ** 2, axis=-1, keepdims=True)
        return (z - mu) / jnp.sqrt(var + 1e-5) * g + b

    x1 = layernorm(x + attn, params["ln1_g"], params["ln1_b"])
    ffn = lin(jnp.maximum(lin(x1, params["w1"], params["b1"]), 0.0), params["w2"], params["b2"])
    x2 = layernorm(x1 + ffn, params["ln2_g"], params["ln2_b"])
    return x2 * mask[..., None].astype(x2.dtype)


if __name__ == "__main__":
    B, T, D, H, FFN = 2, 8, 32, 4, 64

    key = jax.random.PRNGKey(0)
    k_x, k_p = jax.random.split(key)

    x = jax.random.normal(k_x, (B, T, D), jnp.float32)
    # mask: batch 0 fully valid, batch 1 has 2 padding positions
    mask = jnp.array(
        [[1, 1, 1, 1, 1, 1, 1, 1],
         [1, 1, 1, 1, 1, 1, 0, 0]], dtype=jnp.float32)

    params = init_params(k_p, D, FFN)

    out = transformer_encoder_layer(x, mask, params, H)
    out = jax.block_until_ready(out)

    ref = reference_forward(x, mask, params, H)
    # Kernel feeds the MXU bf16 inputs (weights + matmul activations) with f32
    # accumulation and uses an approximate-reciprocal softmax denominator, so
    # it is close to -- but not 1e-3-tight against -- the all-f32 reference.
    assert jnp.allclose(out, ref, rtol=5e-2, atol=1e-1), "mismatch vs reference"
    # padded token positions must be exactly zero (final mask multiply)
    assert jnp.all(out[1, 6:, :] == 0.0), "padded rows not zeroed"

    print("KERNEL_OK")
</pallas_src>

<mosaic_0001>
module attributes {stable_mosaic.version = 11 : i64} {
  func.func @encoder_layer_kernel(%arg0: i32, %arg1: i32, %arg2: memref<1x8x32xf32, #tpu.memory_space<vmem>>, %arg3: memref<1x1x8xf32, #tpu.memory_space<vmem>>, %arg4: memref<1x8x1xf32, #tpu.memory_space<vmem>>, %arg5: memref<1x32x96xbf16, #tpu.memory_space<vmem>>, %arg6: memref<1x1x96xf32, #tpu.memory_space<vmem>>, %arg7: memref<1x32x32xbf16, #tpu.memory_space<vmem>>, %arg8: memref<1x32xf32, #tpu.memory_space<vmem>>, %arg9: memref<1x32xf32, #tpu.memory_space<vmem>>, %arg10: memref<1x32xf32, #tpu.memory_space<vmem>>, %arg11: memref<64x32xbf16, #tpu.memory_space<vmem>>, %arg12: memref<1x1x64xf32, #tpu.memory_space<vmem>>, %arg13: memref<64x32xbf16, #tpu.memory_space<vmem>>, %arg14: memref<1x32xf32, #tpu.memory_space<vmem>>, %arg15: memref<1x32xf32, #tpu.memory_space<vmem>>, %arg16: memref<1x32xf32, #tpu.memory_space<vmem>>, %arg17: memref<1x8x32xf32, #tpu.memory_space<vmem>>, %arg18: memref<8x32xf32, #tpu.memory_space<vmem>>, %arg19: memref<8x32xbf16, #tpu.memory_space<vmem>>) attributes {dimension_semantics = [#tpu.dimension_semantics<parallel>, #tpu.dimension_semantics<arbitrary>], iteration_bounds = array<i64: 2, 1>, scalar_prefetch = 0 : i64, scratch_operands = 2 : i64, tpu.core_type = #tpu.core_type<tc>, window_params = [{transform_indices = @transform_0, window_bounds = array<i64: 1, 8, 32>}, {transform_indices = @transform_1, window_bounds = array<i64: 1, 1, 8>}, {transform_indices = @transform_2, window_bounds = array<i64: 1, 8, 1>}, {transform_indices = @transform_3, window_bounds = array<i64: 1, 32, 96>}, {transform_indices = @transform_4, window_bounds = array<i64: 1, 1, 96>}, {transform_indices = @transform_5, window_bounds = array<i64: 1, 32, 32>}, {pipeline_mode = #tpu.pipeline_mode<synchronous>, transform_indices = @transform_6, window_bounds = array<i64: 1, 32>}, {pipeline_mode = #tpu.pipeline_mode<synchronous>, transform_indices = @transform_7, window_bounds = array<i64: 1, 32>}, {pipeline_mode = #tpu.pipeline_mode<synchronous>, transform_indices = @transform_8, window_bounds = array<i64: 1, 32>}, {pipeline_mode = #tpu.pipeline_mode<synchronous>, transform_indices = @transform_9, window_bounds = array<i64: 64, 32>}, {pipeline_mode = #tpu.pipeline_mode<synchronous>, transform_indices = @transform_10, window_bounds = array<i64: 1, 1, 64>}, {pipeline_mode = #tpu.pipeline_mode<synchronous>, transform_indices = @transform_11, window_bounds = array<i64: 64, 32>}, {pipeline_mode = #tpu.pipeline_mode<synchronous>, transform_indices = @transform_12, window_bounds = array<i64: 1, 32>}, {pipeline_mode = #tpu.pipeline_mode<synchronous>, transform_indices = @transform_13, window_bounds = array<i64: 1, 32>}, {pipeline_mode = #tpu.pipeline_mode<synchronous>, transform_indices = @transform_14, window_bounds = array<i64: 1, 32>}, {transform_indices = @transform_15, window_bounds = array<i64: 1, 8, 32>}]} {
    %c0_i32 = arith.constant 0 : i32
    %0 = arith.cmpi eq, %arg1, %c0_i32 : i32
    %1 = arith.extui %0 : i1 to i32
    %c0_i32_0 = arith.constant 0 : i32
    %2 = arith.cmpi ne, %1, %c0_i32_0 : i32
    scf.if %2 {
      %cst_37 = arith.constant 0.000000e+00 : f32
      %102 = vector.broadcast %cst_37 : f32 to vector<8x32xf32>
      %c0_38 = arith.constant 0 : index
      %c0_39 = arith.constant 0 : index
      %103 = vector.load %arg18[%c0_38, %c0_39] : memref<8x32xf32, #tpu.memory_space<vmem>>, vector<8x32xf32>
      tpu.vector_store %arg18[%c0_38, %c0_39], %102 {strides = array<i32>} : memref<8x32xf32, #tpu.memory_space<vmem>>, vector<8x32xf32>,
      %c0_40 = arith.constant 0 : index
      %c0_41 = arith.constant 0 : index
      %c0_42 = arith.constant 0 : index
      %104 = vector.load %arg2[%c0_40, %c0_41, %c0_42] : memref<1x8x32xf32, #tpu.memory_space<vmem>>, vector<1x8x32xf32>
      %105 = vector.shape_cast %104 : vector<1x8x32xf32> to vector<8x32xf32>
      %106 = arith.truncf %105 : vector<8x32xf32> to vector<8x32xbf16>
      %c0_43 = arith.constant 0 : index
      %c0_44 = arith.constant 0 : index
      %107 = vector.load %arg19[%c0_43, %c0_44] : memref<8x32xbf16, #tpu.memory_space<vmem>>, vector<8x32xbf16>
      tpu.vector_store %arg19[%c0_43, %c0_44], %106 {strides = array<i32>} : memref<8x32xbf16, #tpu.memory_space<vmem>>, vector<8x32xbf16>,
    } else {
    }
    %c0 = arith.constant 0 : index
    %c0_1 = arith.constant 0 : index
    %3 = vector.load %arg19[%c0, %c0_1] : memref<8x32xbf16, #tpu.memory_space<vmem>>, vector<8x32xbf16>
    %c0_2 = arith.constant 0 : index
    %c0_3 = arith.constant 0 : index
    %c0_4 = arith.constant 0 : index
    %4 = vector.load %arg3[%c0_2, %c0_3, %c0_4] : memref<1x1x8xf32, #tpu.memory_space<vmem>>, vector<1x1x8xf32>
    %5 = vector.shape_cast %4 : vector<1x1x8xf32> to vector<1x8xf32>
    %c0_5 = arith.constant 0 : index
    %c0_6 = arith.constant 0 : index
    %c0_7 = arith.constant 0 : index
    %6 = vector.load %arg5[%c0_5, %c0_6, %c0_7] : memref<1x32x96xbf16, #tpu.memory_space<vmem>>, vector<1x32x96xbf16>
    %7 = vector.shape_cast %6 : vector<1x32x96xbf16> to vector<32x96xbf16>
    %cst = arith.constant dense<0.000000e+00> : vector<8x96xf32>
    %8 = tpu.matmul %3, %7, %cst {dimension_numbers = #tpu.dot_dimension_numbers<[1], [0], [0], [1], [0, 0, 1, 1], [], []>} : vector<8x32xbf16>, vector<32x96xbf16>, vector<8x96xf32> -> vector<8x96xf32>
    %c0_8 = arith.constant 0 : index
    %c0_9 = arith.constant 0 : index
    %c0_10 = arith.constant 0 : index
    %9 = vector.load %arg6[%c0_8, %c0_9, %c0_10] : memref<1x1x96xf32, #tpu.memory_space<vmem>>, vector<1x1x96xf32>
    %10 = vector.shape_cast %9 : vector<1x1x96xf32> to vector<1x96xf32>
    %11 = vector.broadcast %10 : vector<1x96xf32> to vector<8x96xf32>
    %12 = arith.addf %8, %11 : vector<8x96xf32>
    %13 = vector.extract_strided_slice %12 {offsets = [0, 0], sizes = [8, 32], strides = [1, 1]} : vector<8x96xf32> to vector<8x32xf32>
    %14 = arith.truncf %13 : vector<8x32xf32> to vector<8x32xbf16>
    %15 = vector.extract_strided_slice %12 {offsets = [0, 32], sizes = [8, 32], strides = [1, 1]} : vector<8x96xf32> to vector<8x32xf32>
    %16 = arith.truncf %15 : vector<8x32xf32> to vector<8x32xbf16>
    %17 = vector.extract_strided_slice %12 {offsets = [0, 64], sizes = [8, 32], strides = [1, 1]} : vector<8x96xf32> to vector<8x32xf32>
    %18 = arith.truncf %17 : vector<8x32xf32> to vector<8x32xbf16>
    %19 = vector.extract_strided_slice %14 {offsets = [0, 0], sizes = [8, 8], strides = [1, 1]} : vector<8x32xbf16> to vector<8x8xbf16>
    %20 = vector.extract_strided_slice %16 {offsets = [0, 0], sizes = [8, 8], strides = [1, 1]} : vector<8x32xbf16> to vector<8x8xbf16>
    %cst_11 = arith.constant dense<0.000000e+00> : vector<8x8xf32>
    %21 = tpu.matmul %19, %20, %cst_11 {dimension_numbers = #tpu.dot_dimension_numbers<[1], [1], [0], [0], [0, 0, 1, 0], [], []>} : vector<8x8xbf16>, vector<8x8xbf16>, vector<8x8xf32> -> vector<8x8xf32>
    %22 = vector.broadcast %5 : vector<1x8xf32> to vector<8x8xf32>
    %23 = arith.addf %21, %22 : vector<8x8xf32>
    %cst_12 = arith.constant dense<0xFF800000> : vector<8xf32>
    %24 = vector.multi_reduction <maximumf>, %23, %cst_12 [1] : vector<8x8xf32> to vector<8xf32>
    %25 = vector.shape_cast %24 : vector<8xf32> to vector<8x1xf32>
    %26 = vector.broadcast %25 : vector<8x1xf32> to vector<8x8xf32>
    %27 = arith.subf %23, %26 : vector<8x8xf32>
    %28 = math.exp %27 : vector<8x8xf32>
    %cst_13 = arith.constant dense<0.000000e+00> : vector<8xf32>
    %29 = vector.multi_reduction <add>, %28, %cst_13 [1] : vector<8x8xf32> to vector<8xf32>
    %30 = vector.shape_cast %29 : vector<8xf32> to vector<8x1xf32>
    %31 = arith.truncf %28 : vector<8x8xf32> to vector<8x8xbf16>
    %32 = vector.extract_strided_slice %18 {offsets = [0, 0], sizes = [8, 8], strides = [1, 1]} : vector<8x32xbf16> to vector<8x8xbf16>
    %cst_14 = arith.constant dense<0.000000e+00> : vector<8x8xf32>
    %33 = tpu.matmul %31, %32, %cst_14 {dimension_numbers = #tpu.dot_dimension_numbers<[1], [0], [0], [1], [0, 0, 1, 1], [], []>} : vector<8x8xbf16>, vector<8x8xbf16>, vector<8x8xf32> -> vector<8x8xf32>
    %34 = tpu.reciprocal %30 {approx = true} : vector<8x1xf32> -> vector<8x1xf32>
    %35 = vector.broadcast %34 : vector<8x1xf32> to vector<8x8xf32>
    %36 = arith.mulf %33, %35 : vector<8x8xf32>
    %37 = vector.extract_strided_slice %14 {offsets = [0, 8], sizes = [8, 8], strides = [1, 1]} : vector<8x32xbf16> to vector<8x8xbf16>
    %38 = vector.extract_strided_slice %16 {offsets = [0, 8], sizes = [8, 8], strides = [1, 1]} : vector<8x32xbf16> to vector<8x8xbf16>
    %cst_15 = arith.constant dense<0.000000e+00> : vector<8x8xf32>
    %39 = tpu.matmul %37, %38, %cst_15 {dimension_numbers = #tpu.dot_dimension_numbers<[1], [1], [0], [0], [0, 0, 1, 0], [], []>} : vector<8x8xbf16>, vector<8x8xbf16>, vector<8x8xf32> -> vector<8x8xf32>
    %40 = vector.broadcast %5 : vector<1x8xf32> to vector<8x8xf32>
    %41 = arith.addf %39, %40 : vector<8x8xf32>
    %cst_16 = arith.constant dense<0xFF800000> : vector<8xf32>
    %42 = vector.multi_reduction <maximumf>, %41, %cst_16 [1] : vector<8x8xf32> to vector<8xf32>
    %43 = vector.shape_cast %42 : vector<8xf32> to vector<8x1xf32>
    %44 = vector.broadcast %43 : vector<8x1xf32> to vector<8x8xf32>
    %45 = arith.subf %41, %44 : vector<8x8xf32>
    %46 = math.exp %45 : vector<8x8xf32>
    %cst_17 = arith.constant dense<0.000000e+00> : vector<8xf32>
    %47 = vector.multi_reduction <add>, %46, %cst_17 [1] : vector<8x8xf32> to vector<8xf32>
    %48 = vector.shape_cast %47 : vector<8xf32> to vector<8x1xf32>
    %49 = arith.truncf %46 : vector<8x8xf32> to vector<8x8xbf16>
    %50 = vector.extract_strided_slice %18 {offsets = [0, 8], sizes = [8, 8], strides = [1, 1]} : vector<8x32xbf16> to vector<8x8xbf16>
    %cst_18 = arith.constant dense<0.000000e+00> : vector<8x8xf32>
    %51 = tpu.matmul %49, %50, %cst_18 {dimension_numbers = #tpu.dot_dimension_numbers<[1], [0], [0], [1], [0, 0, 1, 1], [], []>} : vector<8x8xbf16>, vector<8x8xbf16>, vector<8x8xf32> -> vector<8x8xf32>
    %52 = tpu.reciprocal %48 {approx = true} : vector<8x1xf32> -> vector<8x1xf32>
    %53 = vector.broadcast %52 : vector<8x1xf32> to vector<8x8xf32>
    %54 = arith.mulf %51, %53 : vector<8x8xf32>
    %55 = vector.extract_strided_slice %14 {offsets = [0, 16], sizes = [8, 8], strides = [1, 1]} : vector<8x32xbf16> to vector<8x8xbf16>
    %56 = vector.extract_strided_slice %16 {offsets = [0, 16], sizes = [8, 8], strides = [1, 1]} : vector<8x32xbf16> to vector<8x8xbf16>
    %cst_19 = arith.constant dense<0.000000e+00> : vector<8x8xf32>
    %57 = tpu.matmul %55, %56, %cst_19 {dimension_numbers = #tpu.dot_dimension_numbers<[1], [1], [0], [0], [0, 0, 1, 0], [], []>} : vector<8x8xbf16>, vector<8x8xbf16>, vector<8x8xf32> -> vector<8x8xf32>
    %58 = vector.broadcast %5 : vector<1x8xf32> to vector<8x8xf32>
    %59 = arith.addf %57, %58 : vector<8x8xf32>
    %cst_20 = arith.constant dense<0xFF800000> : vector<8xf32>
    %60 = vector.multi_reduction <maximumf>, %59, %cst_20 [1] : vector<8x8xf32> to vector<8xf32>
    %61 = vector.shape_cast %60 : vector<8xf32> to vector<8x1xf32>
    %62 = vector.broadcast %61 : vector<8x1xf32> to vector<8x8xf32>
    %63 = arith.subf %59, %62 : vector<8x8xf32>
    %64 = math.exp %63 : vector<8x8xf32>
    %cst_21 = arith.constant dense<0.000000e+00> : vector<8xf32>
    %65 = vector.multi_reduction <add>, %64, %cst_21 [1] : vector<8x8xf32> to vector<8xf32>
    %66 = vector.shape_cast %65 : vector<8xf32> to vector<8x1xf32>
    %67 = arith.truncf %64 : vector<8x8xf32> to vector<8x8xbf16>
    %68 = vector.extract_strided_slice %18 {offsets = [0, 16], sizes = [8, 8], strides = [1, 1]} : vector<8x32xbf16> to vector<8x8xbf16>
    %cst_22 = arith.constant dense<0.000000e+00> : vector<8x8xf32>
    %69 = tpu.matmul %67, %68, %cst_22 {dimension_numbers = #tpu.dot_dimension_numbers<[1], [0], [0], [1], [0, 0, 1, 1], [], []>} : vector<8x8xbf16>, vector<8x8xbf16>, vector<8x8xf32> -> vector<8x8xf32>
    %70 = tpu.reciprocal %66 {approx = true} : vector<8x1xf32> -> vector<8x1xf32>
    %71 = vector.broadcast %70 : vector<8x1xf32> to vector<8x8xf32>
    %72 = arith.mulf %69, %71 : vector<8x8xf32>
    %73 = vector.extract_strided_slice %14 {offsets = [0, 24], sizes = [8, 8], strides = [1, 1]} : vector<8x32xbf16> to vector<8x8xbf16>
    %74 = vector.extract_strided_slice %16 {offsets = [0, 24], sizes = [8, 8], strides = [1, 1]} : vector<8x32xbf16> to vector<8x8xbf16>
    %cst_23 = arith.constant dense<0.000000e+00> : vector<8x8xf32>
    %75 = tpu.matmul %73, %74, %cst_23 {dimension_numbers = #tpu.dot_dimension_numbers<[1], [1], [0], [0], [0, 0, 1, 0], [], []>} : vector<8x8xbf16>, vector<8x8xbf16>, vector<8x8xf32> -> vector<8x8xf32>
    %76 = vector.broadcast %5 : vector<1x8xf32> to vector<8x8xf32>
    %77 = arith.addf %75, %76 : vector<8x8xf32>
    %cst_24 = arith.constant dense<0xFF800000> : vector<8xf32>
    %78 = vector.multi_reduction <maximumf>, %77, %cst_24 [1] : vector<8x8xf32> to vector<8xf32>
    %79 = vector.shape_cast %78 : vector<8xf32> to vector<8x1xf32>
    %80 = vector.broadcast %79 : vector<8x1xf32> to vector<8x8xf32>
    %81 = arith.subf %77, %80 : vector<8x8xf32>
    %82 = math.exp %81 : vector<8x8xf32>
    %cst_25 = arith.constant dense<0.000000e+00> : vector<8xf32>
    %83 = vector.multi_reduction <add>, %82, %cst_25 [1] : vector<8x8xf32> to vector<8xf32>
    %84 = vector.shape_cast %83 : vector<8xf32> to vector<8x1xf32>
    %85 = arith.truncf %82 : vector<8x8xf32> to vector<8x8xbf16>
    %86 = vector.extract_strided_slice %18 {offsets = [0, 24], sizes = [8, 8], strides = [1, 1]} : vector<8x32xbf16> to vector<8x8xbf16>
    %cst_26 = arith.constant dense<0.000000e+00> : vector<8x8xf32>
    %87 = tpu.matmul %85, %86, %cst_26 {dimension_numbers = #tpu.dot_dimension_numbers<[1], [0], [0], [1], [0, 0, 1, 1], [], []>} : vector<8x8xbf16>, vector<8x8xbf16>, vector<8x8xf32> -> vector<8x8xf32>
    %88 = tpu.reciprocal %84 {approx = true} : vector<8x1xf32> -> vector<8x1xf32>
    %89 = vector.broadcast %88 : vector<8x1xf32> to vector<8x8xf32>
    %90 = arith.mulf %87, %89 : vector<8x8xf32>
    %91 = tpu.concatenate %36, %54, %72, %90 in 1 : vector<8x8xf32>, vector<8x8xf32>, vector<8x8xf32>, vector<8x8xf32> -> vector<8x32xf32>
    %c0_27 = arith.constant 0 : index
    %c0_28 = arith.constant 0 : index
    %92 = vector.load %arg18[%c0_27, %c0_28] : memref<8x32xf32, #tpu.memory_space<vmem>>, vector<8x32xf32>
    %93 = arith.truncf %91 : vector<8x32xf32> to vector<8x32xbf16>
    %c0_29 = arith.constant 0 : index
    %c0_30 = arith.constant 0 : index
    %c0_31 = arith.constant 0 : index
    %94 = vector.load %arg7[%c0_29, %c0_30, %c0_31] : memref<1x32x32xbf16, #tpu.memory_space<vmem>>, vector<1x32x32xbf16>
    %95 = vector.shape_cast %94 : vector<1x32x32xbf16> to vector<32x32xbf16>
    %cst_32 = arith.constant dense<0.000000e+00> : vector<8x32xf32>
    %96 = tpu.matmul %93, %95, %cst_32 {dimension_numbers = #tpu.dot_dimension_numbers<[1], [0], [0], [1], [0, 0, 1, 1], [], []>} : vector<8x32xbf16>, vector<32x32xbf16>, vector<8x32xf32> -> vector<8x32xf32>
    %97 = arith.addf %92, %96 : vector<8x32xf32>
    %c0_33 = arith.constant 0 : index
    %c0_34 = arith.constant 0 : index
    %98 = vector.load %arg18[%c0_33, %c0_34] : memref<8x32xf32, #tpu.memory_space<vmem>>, vector<8x32xf32>
    tpu.vector_store %arg18[%c0_33, %c0_34], %97 {strides = array<i32>} : memref<8x32xf32, #tpu.memory_space<vmem>>, vector<8x32xf32>,
    %c0_i32_35 = arith.constant 0 : i32
    %99 = arith.cmpi eq, %arg1, %c0_i32_35 : i32
    %100 = arith.extui %99 : i1 to i32
    %c0_i32_36 = arith.constant 0 : i32
    %101 = arith.cmpi ne, %100, %c0_i32_36 : i32
    scf.if %101 {
      %c0_37 = arith.constant 0 : index
      %c0_38 = arith.constant 0 : index
      %c0_39 = arith.constant 0 : index
      %102 = vector.load %arg2[%c0_37, %c0_38, %c0_39] : memref<1x8x32xf32, #tpu.memory_space<vmem>>, vector<1x8x32xf32>
      %103 = vector.shape_cast %102 : vector<1x8x32xf32> to vector<8x32xf32>
      %c0_40 = arith.constant 0 : index
      %c0_41 = arith.constant 0 : index
      %104 = vector.load %arg18[%c0_40, %c0_41] : memref<8x32xf32, #tpu.memory_space<vmem>>, vector<8x32xf32>
      %c0_42 = arith.constant 0 : index
      %c0_43 = arith.constant 0 : index
      %105 = vector.load %arg8[%c0_42, %c0_43] : memref<1x32xf32, #tpu.memory_space<vmem>>, vector<1x32xf32>
      %106 = vector.broadcast %105 : vector<1x32xf32> to vector<8x32xf32>
      %107 = arith.addf %104, %106 : vector<8x32xf32>
      %108 = arith.addf %103, %107 : vector<8x32xf32>
      %cst_44 = arith.constant dense<0.000000e+00> : vector<8xf32>
      %109 = vector.multi_reduction <add>, %108, %cst_44 [1] : vector<8x32xf32> to vector<8xf32>
      %110 = vector.shape_cast %109 : vector<8xf32> to vector<8x1xf32>
      %cst_45 = arith.constant 3.200000e+01 : f32
      %111 = vector.broadcast %cst_45 : f32 to vector<8x1xf32>
      %112 = arith.divf %110, %111 : vector<8x1xf32>
      %113 = vector.broadcast %112 : vector<8x1xf32> to vector<8x32xf32>
      %114 = arith.subf %108, %113 : vector<8x32xf32>
      %115 = arith.mulf %114, %114 : vector<8x32xf32>
      %cst_46 = arith.constant dense<0.000000e+00> : vector<8xf32>
      %116 = vector.multi_reduction <add>, %115, %cst_46 [1] : vector<8x32xf32> to vector<8xf32>
      %117 = vector.shape_cast %116 : vector<8xf32> to vector<8x1xf32>
      %cst_47 = arith.constant 3.200000e+01 : f32
      %118 = vector.broadcast %cst_47 : f32 to vector<8x1xf32>
      %119 = arith.divf %117, %118 : vector<8x1xf32>
      %120 = vector.broadcast %112 : vector<8x1xf32> to vector<8x32xf32>
      %121 = arith.subf %108, %120 : vector<8x32xf32>
      %cst_48 = arith.constant 9.99999974E-6 : f32
      %122 = vector.broadcast %cst_48 : f32 to vector<8x1xf32>
      %123 = arith.addf %119, %122 : vector<8x1xf32>
      %124 = math.rsqrt %123 : vector<8x1xf32>
      %125 = vector.broadcast %124 : vector<8x1xf32> to vector<8x32xf32>
      %126 = arith.mulf %121, %125 : vector<8x32xf32>
      %c0_49 = arith.constant 0 : index
      %c0_50 = arith.constant 0 : index
      %127 = vector.load %arg9[%c0_49, %c0_50] : memref<1x32xf32, #tpu.memory_space<vmem>>, vector<1x32xf32>
      %128 = vector.broadcast %127 : vector<1x32xf32> to vector<8x32xf32>
      %129 = arith.mulf %126, %128 : vector<8x32xf32>
      %c0_51 = arith.constant 0 : index
      %c0_52 = arith.constant 0 : index
      %130 = vector.load %arg10[%c0_51, %c0_52] : memref<1x32xf32, #tpu.memory_space<vmem>>, vector<1x32xf32>
      %131 = vector.broadcast %130 : vector<1x32xf32> to vector<8x32xf32>
      %132 = arith.addf %129, %131 : vector<8x32xf32>
      %133 = arith.truncf %132 : vector<8x32xf32> to vector<8x32xbf16>
      %c0_53 = arith.constant 0 : index
      %c0_54 = arith.constant 0 : index
      %134 = vector.load %arg19[%c0_53, %c0_54] : memref<8x32xbf16, #tpu.memory_space<vmem>>, vector<8x32xbf16>
      tpu.vector_store %arg19[%c0_53, %c0_54], %133 {strides = array<i32>} : memref<8x32xbf16, #tpu.memory_space<vmem>>, vector<8x32xbf16>,
      %cst_55 = arith.constant 0.000000e+00 : f32
      %135 = vector.broadcast %cst_55 : f32 to vector<8x32xf32>
      %c0_56 = arith.constant 0 : index
      %c0_57 = arith.constant 0 : index
      %136 = vector.load %arg18[%c0_56, %c0_57] : memref<8x32xf32, #tpu.memory_space<vmem>>, vector<8x32xf32>
      tpu.vector_store %arg18[%c0_56, %c0_57], %135 {strides = array<i32>} : memref<8x32xf32, #tpu.memory_space<vmem>>, vector<8x32xf32>,
      %c0_i32_58 = arith.constant 0 : i32
      %c64_i32 = arith.constant 64 : i32
      %137 = arith.muli %c0_i32_58, %c64_i32 : i32
      %138 = tpu.assume_multiple %137, 64 : i32
      %139 = arith.index_cast %138 : i32 to index
      %c0_59 = arith.constant 0 : index
      %140 = vector.load %arg11[%139, %c0_59] : memref<64x32xbf16, #tpu.memory_space<vmem>>, vector<64x32xbf16>
      %c0_60 = arith.constant 0 : index
      %c0_61 = arith.constant 0 : index
      %141 = vector.load %arg19[%c0_60, %c0_61] : memref<8x32xbf16, #tpu.memory_space<vmem>>, vector<8x32xbf16>
      %cst_62 = arith.constant dense<0.000000e+00> : vector<8x64xf32>
      %142 = tpu.matmul %141, %140, %cst_62 {dimension_numbers = #tpu.dot_dimension_numbers<[1], [1], [0], [0], [0, 0, 1, 0], [], []>} : vector<8x32xbf16>, vector<64x32xbf16>, vector<8x64xf32> -> vector<8x64xf32>
      %143 = arith.index_cast %c0_i32_58 : i32 to index
      %c0_63 = arith.constant 0 : index
      %c0_64 = arith.constant 0 : index
      %144 = vector.load %arg12[%143, %c0_63, %c0_64] : memref<1x1x64xf32, #tpu.memory_space<vmem>>, vector<1x1x64xf32>
      %145 = vector.shape_cast %144 : vector<1x1x64xf32> to vector<1x64xf32>
      %146 = vector.broadcast %145 : vector<1x64xf32> to vector<8x64xf32>
      %147 = arith.addf %142, %146 : vector<8x64xf32>
      %cst_65 = arith.constant 0.000000e+00 : f32
      %148 = vector.broadcast %cst_65 : f32 to vector<8x64xf32>
      %149 = arith.maximumf %147, %148 : vector<8x64xf32>
      %c0_66 = arith.constant 0 : index
      %c0_67 = arith.constant 0 : index
      %150 = vector.load %arg18[%c0_66, %c0_67] : memref<8x32xf32, #tpu.memory_space<vmem>>, vector<8x32xf32>
      %151 = arith.truncf %149 : vector<8x64xf32> to vector<8x64xbf16>
      %152 = arith.index_cast %138 : i32 to index
      %c0_68 = arith.constant 0 : index
      %153 = vector.load %arg13[%152, %c0_68] : memref<64x32xbf16, #tpu.memory_space<vmem>>, vector<64x32xbf16>
      %cst_69 = arith.constant dense<0.000000e+00> : vector<8x32xf32>
      %154 = tpu.matmul %151, %153, %cst_69 {dimension_numbers = #tpu.dot_dimension_numbers<[1], [0], [0], [1], [0, 0, 1, 1], [], []>} : vector<8x64xbf16>, vector<64x32xbf16>, vector<8x32xf32> -> vector<8x32xf32>
      %155 = arith.addf %150, %154 : vector<8x32xf32>
      %c0_70 = arith.constant 0 : index
      %c0_71 = arith.constant 0 : index
      %156 = vector.load %arg18[%c0_70, %c0_71] : memref<8x32xf32, #tpu.memory_space<vmem>>, vector<8x32xf32>
      tpu.vector_store %arg18[%c0_70, %c0_71], %155 {strides = array<i32>} : memref<8x32xf32, #tpu.memory_space<vmem>>, vector<8x32xf32>,
      %c1_i32 = arith.constant 1 : i32
      %c0_72 = arith.constant 0 : index
      %c0_73 = arith.constant 0 : index
      %157 = vector.load %arg18[%c0_72, %c0_73] : memref<8x32xf32, #tpu.memory_space<vmem>>, vector<8x32xf32>
      %158 = arith.addf %132, %157 : vector<8x32xf32>
      %c0_74 = arith.constant 0 : index
      %c0_75 = arith.constant 0 : index
      %159 = vector.load %arg14[%c0_74, %c0_75] : memref<1x32xf32, #tpu.memory_space<vmem>>, vector<1x32xf32>
      %160 = vector.broadcast %159 : vector<1x32xf32> to vector<8x32xf32>
      %161 = arith.addf %158, %160 : vector<8x32xf32>
      %cst_76 = arith.constant dense<0.000000e+00> : vector<8xf32>
      %162 = vector.multi_reduction <add>, %161, %cst_76 [1] : vector<8x32xf32> to vector<8xf32>
      %163 = vector.shape_cast %162 : vector<8xf32> to vector<8x1xf32>
      %cst_77 = arith.constant 3.200000e+01 : f32
      %164 = vector.broadcast %cst_77 : f32 to vector<8x1xf32>
      %165 = arith.divf %163, %164 : vector<8x1xf32>
      %166 = vector.broadcast %165 : vector<8x1xf32> to vector<8x32xf32>
      %167 = arith.subf %161, %166 : vector<8x32xf32>
      %168 = arith.mulf %167, %167 : vector<8x32xf32>
      %cst_78 = arith.constant dense<0.000000e+00> : vector<8xf32>
      %169 = vector.multi_reduction <add>, %168, %cst_78 [1] : vector<8x32xf32> to vector<8xf32>
      %170 = vector.shape_cast %169 : vector<8xf32> to vector<8x1xf32>
      %cst_79 = arith.constant 3.200000e+01 : f32
      %171 = vector.broadcast %cst_79 : f32 to vector<8x1xf32>
      %172 = arith.divf %170, %171 : vector<8x1xf32>
      %173 = vector.broadcast %165 : vector<8x1xf32> to vector<8x32xf32>
      %174 = arith.subf %161, %173 : vector<8x32xf32>
      %cst_80 = arith.constant 9.99999974E-6 : f32
      %175 = vector.broadcast %cst_80 : f32 to vector<8x1xf32>
      %176 = arith.addf %172, %175 : vector<8x1xf32>
      %177 = math.rsqrt %176 : vector<8x1xf32>
      %178 = vector.broadcast %177 : vector<8x1xf32> to vector<8x32xf32>
      %179 = arith.mulf %174, %178 : vector<8x32xf32>
      %c0_81 = arith.constant 0 : index
      %c0_82 = arith.constant 0 : index
      %180 = vector.load %arg15[%c0_81, %c0_82] : memref<1x32xf32, #tpu.memory_space<vmem>>, vector<1x32xf32>
      %181 = vector.broadcast %180 : vector<1x32xf32> to vector<8x32xf32>
      %182 = arith.mulf %179, %181 : vector<8x32xf32>
      %c0_83 = arith.constant 0 : index
      %c0_84 = arith.constant 0 : index
      %183 = vector.load %arg16[%c0_83, %c0_84] : memref<1x32xf32, #tpu.memory_space<vmem>>, vector<1x32xf32>
      %184 = vector.broadcast %183 : vector<1x32xf32> to vector<8x32xf32>
      %185 = arith.addf %182, %184 : vector<8x32xf32>
      %c0_85 = arith.constant 0 : index
      %c0_86 = arith.constant 0 : index
      %c0_87 = arith.constant 0 : index
      %186 = vector.load %arg4[%c0_85, %c0_86, %c0_87] : memref<1x8x1xf32, #tpu.memory_space<vmem>>, vector<1x8x1xf32>
      %187 = vector.shape_cast %186 : vector<1x8x1xf32> to vector<8x1xf32>
      %188 = vector.broadcast %187 : vector<8x1xf32> to vector<8x32xf32>
      %189 = arith.mulf %185, %188 : vector<8x32xf32>
      %c0_88 = arith.constant 0 : index
      %c0_89 = arith.constant 0 : index
      %c0_90 = arith.constant 0 : index
      %190 = vector.load %arg17[%c0_88, %c0_89, %c0_90] : memref<1x8x32xf32, #tpu.memory_space<vmem>>, vector<1x8x32xf32>
      %191 = vector.shape_cast %190 : vector<1x8x32xf32> to vector<8x32xf32>
      %192 = vector.shape_cast %189 : vector<8x32xf32> to vector<1x8x32xf32>
      tpu.vector_store %arg17[%c0_88, %c0_89, %c0_90], %192 {strides = array<i32>} : memref<1x8x32xf32, #tpu.memory_space<vmem>>, vector<1x8x32xf32>,
    } else {
    }
    return
  }
  func.func @transform_0(%arg0: i32, %arg1: i32) -> (i32, i32, i32) {
    %c0_i32 = arith.constant 0 : i32
    %c0_i32_0 = arith.constant 0 : i32
    %c0_i32_1 = arith.constant 0 : i32
    return %arg0, %c0_i32, %c0_i32_0 : i32, i32, i32
  }
  func.func @transform_1(%arg0: i32, %arg1: i32) -> (i32, i32, i32) {
    %c0_i32 = arith.constant 0 : i32
    %c0_i32_0 = arith.constant 0 : i32
    %c0_i32_1 = arith.constant 0 : i32
    return %arg0, %c0_i32, %c0_i32_0 : i32, i32, i32
  }
  func.func @transform_2(%arg0: i32, %arg1: i32) -> (i32, i32, i32) {
    %c0_i32 = arith.constant 0 : i32
    %c0_i32_0 = arith.constant 0 : i32
    %c0_i32_1 = arith.constant 0 : i32
    return %arg0, %c0_i32, %c0_i32_0 : i32, i32, i32
  }
  func.func @transform_3(%arg0: i32, %arg1: i32) -> (i32, i32, i32) {
    %c0_i32 = arith.constant 0 : i32
    %c0_i32_0 = arith.constant 0 : i32
    %c0_i32_1 = arith.constant 0 : i32
    return %arg1, %c0_i32, %c0_i32_0 : i32, i32, i32
  }
  func.func @transform_4(%arg0: i32, %arg1: i32) -> (i32, i32, i32) {
    %c0_i32 = arith.constant 0 : i32
    %c0_i32_0 = arith.constant 0 : i32
    %c0_i32_1 = arith.constant 0 : i32
    return %arg1, %c0_i32, %c0_i32_0 : i32, i32, i32
  }
  func.func @transform_5(%arg0: i32, %arg1: i32) -> (i32, i32, i32) {
    %c0_i32 = arith.constant 0 : i32
    %c0_i32_0 = arith.constant 0 : i32
    %c0_i32_1 = arith.constant 0 : i32
    return %arg1, %c0_i32, %c0_i32_0 : i32, i32, i32
  }
  func.func @transform_6(%arg0: i32, %arg1: i32) -> (i32, i32) {
    %c0_i32 = arith.constant 0 : i32
    %c0_i32_0 = arith.constant 0 : i32
    %c0_i32_1 = arith.constant 0 : i32
    return %c0_i32, %c0_i32_0 : i32, i32
  }
  func.func @transform_7(%arg0: i32, %arg1: i32) -> (i32, i32) {
    %c0_i32 = arith.constant 0 : i32
    %c0_i32_0 = arith.constant 0 : i32
    %c0_i32_1 = arith.constant 0 : i32
    return %c0_i32, %c0_i32_0 : i32, i32
  }
  func.func @transform_8(%arg0: i32, %arg1: i32) -> (i32, i32) {
    %c0_i32 = arith.constant 0 : i32
    %c0_i32_0 = arith.constant 0 : i32
    %c0_i32_1 = arith.constant 0 : i32
    return %c0_i32, %c0_i32_0 : i32, i32
  }
  func.func @transform_9(%arg0: i32, %arg1: i32) -> (i32, i32) {
    %c0_i32 = arith.constant 0 : i32
    %c0_i32_0 = arith.constant 0 : i32
    %c0_i32_1 = arith.constant 0 : i32
    return %c0_i32, %c0_i32_0 : i32, i32
  }
  func.func @transform_10(%arg0: i32, %arg1: i32) -> (i32, i32, i32) {
    %c0_i32 = arith.constant 0 : i32
    %c0_i32_0 = arith.constant 0 : i32
    %c0_i32_1 = arith.constant 0 : i32
    %c0_i32_2 = arith.constant 0 : i32
    return %c0_i32, %c0_i32_0, %c0_i32_1 : i32, i32, i32
  }
  func.func @transform_11(%arg0: i32, %arg1: i32) -> (i32, i32) {
    %c0_i32 = arith.constant 0 : i32
    %c0_i32_0 = arith.constant 0 : i32
    %c0_i32_1 = arith.constant 0 : i32
    return %c0_i32, %c0_i32_0 : i32, i32
  }
  func.func @transform_12(%arg0: i32, %arg1: i32) -> (i32, i32) {
    %c0_i32 = arith.constant 0 : i32
    %c0_i32_0 = arith.constant 0 : i32
    %c0_i32_1 = arith.constant 0 : i32
    return %c0_i32, %c0_i32_0 : i32, i32
  }
  func.func @transform_13(%arg0: i32, %arg1: i32) -> (i32, i32) {
    %c0_i32 = arith.constant 0 : i32
    %c0_i32_0 = arith.constant 0 : i32
    %c0_i32_1 = arith.constant 0 : i32
    return %c0_i32, %c0_i32_0 : i32, i32
  }
  func.func @transform_14(%arg0: i32, %arg1: i32) -> (i32, i32) {
    %c0_i32 = arith.constant 0 : i32
    %c0_i32_0 = arith.constant 0 : i32
    %c0_i32_1 = arith.constant 0 : i32
    return %c0_i32, %c0_i32_0 : i32, i32
  }
  func.func @transform_15(%arg0: i32, %arg1: i32) -> (i32, i32, i32) {
    %c0_i32 = arith.constant 0 : i32
    %c0_i32_0 = arith.constant 0 : i32
    %c0_i32_1 = arith.constant 0 : i32
    return %arg0, %c0_i32, %c0_i32_0 : i32, i32, i32
  }
}

</mosaic_0001>

<bundles_post_ra>
// kernel: tpu_custom_call.1
= control target key start
LH: loop header
LB: loop body
LE: loop exit
PB: predicated region body
PF: predicated region fallthrough
CT: control target
= control target key end

     0   :  { %s1890_s0 = inlined_call_operand.vmem [shape: f32[2,8,32], index: 0, kind: input, shape index: {}]   ;;  %s1891_s1 = inlined_call_operand.vmem [shape: f32[2,1,8], index: 1, kind: input, shape index: {}]   ;;  %s1892_s2 = inlined_call_operand.vmem [shape: f32[2,8,1], index: 2, kind: input, shape index: {}]   ;;  %s1893_s3 = inlined_call_operand.vmem [shape: bf16[1,32,96], index: 3, kind: input, shape index: {}]   ;;  %s1894_s4 = inlined_call_operand.vmem [shape: f32[1,1,96], index: 4, kind: input, shape index: {}]   ;;  %s1895_s5 = inlined_call_operand.vmem [shape: bf16[1,32,32], index: 5, kind: input, shape index: {}]   ;;  %s1896_s6 = inlined_call_operand.vmem [shape: f32[1,32], index: 6, kind: input, shape index: {}]   ;;  %s1897_s7 = inlined_call_operand.vmem [shape: f32[1,32], index: 7, kind: input, shape index: {}]   ;;  %s1898_s8 = inlined_call_operand.vmem [shape: f32[1,32], index: 8, kind: input, shape index: {}]   ;;  %s1899_s9 = inlined_call_operand.vmem [shape: bf16[64,32], index: 9, kind: input, shape index: {}]   ;;  %s1900_s10 = inlined_call_operand.vmem [shape: f32[1,1,64], index: 10, kind: input, shape index: {}]   ;;  %s1901_s11 = inlined_call_operand.vmem [shape: bf16[64,32], index: 11, kind: input, shape index: {}]   ;;  %s1902_s12 = inlined_call_operand.vmem [shape: f32[1,32], index: 12, kind: input, shape index: {}]   ;;  %s1903_s13 = inlined_call_operand.vmem [shape: f32[1,32], index: 13, kind: input, shape index: {}]   ;;  %s1904_s14 = inlined_call_operand.vmem [shape: f32[1,32], index: 14, kind: input, shape index: {}]   ;;  %s1905_s15 = inlined_call_operand.hbm [shape: f32[2,8,32], index: 15, kind: output, shape index: {}]  }
   0x1   :  { %1910 = sst [smem:[#allocation11_spill]] %s1890_s0 }
   0x2   :  { %1911 = sst [smem:[#allocation12_spill]] %s1891_s1 }
   0x3   :  { %1912 = sst [smem:[#allocation13_spill]] %s1892_s2 }
   0x4   :  { %20 = vsyncpa [#allocation5], 0 }
   0x5   :  { %22 = vsyncpa [#allocation5 + $0x1], 0  ;;  %s1652_s18 = smov 0   ;;  %s1654_s19 = smov 0  }
   0x6   :  { %s1656_s20 = smov 0   ;;  %s1658_s21 = smov 0  }
   0x7   :  { %s1660_s22 = smov 0   ;;  %s1662_s23 = smov 0  }
   0x8 LB: > { %1913 = sst [smem:[#allocation7_spill]] %s1541_s20  ;;  %s1283_s24 = sadd.s32 4294967295, %s1553_s23   ;;  %s1553_s23 = sphi %s1662_s23, %s28_s23   ;;  %s1549_s22 = sphi %s1660_s22, %s1926_s22   ;;  %s1545_s21 = sphi %s1658_s21, %s1925_s21   ;;  %s1541_s20 = sphi %s1656_s20, %s1924_s20   ;;  %s1537_s19 = sphi %s1654_s19, %s1928_s19   ;;  %s1533_s18 = sphi %s1652_s18, %s1927_s18  }
   0x9   : > { %1914 = sst [smem:[#allocation8_spill]] %s1549_s22  ;;  %s1284_s25 = sadd.s32 4294967294, %s1553_s23  }
   0xa   : > { %s40_s26 = sadd.s32 1, %s1549_s22  ;;  %s392_s27 = sadd.s32 1, %s1541_s20 }
   0xb   : > { %p42_p0 = scmp.ge.s32.totalorder %s40_s26, 2  ;;  %p402_p1 = scmp.ne.s32.totalorder %s1541_s20, %s1537_s19 }
   0xc   : > { %p403_p2 = scmp.eq.s32.totalorder %s1283_s24, 1  ;;  %p408_p3 = scmp.ne.s32.totalorder %s1537_s19, %s1533_s18 }
   0xd   : > { %s1930_s26 = smov (%p42_p0, %s40_s26), 0  ;;  %p409_p5 = scmp.eq.s32.totalorder %s1284_s25, 1 }
   0xe   : > { %1915 = sst [smem:[#allocation9_spill]] %s1930_s26  ;;  %p1692_p4 = por %p403_p2, %p402_p1 }
   0xf   : > { %s389_s29 = ssub.s32 %s1549_s22, %s1930_s26  ;;  %p1290_p6 = scmp.ge.s32.totalorder %s1553_s23, 1 }
  0x10   : > { %p390_p7 = scmp.eq.s32.totalorder %s389_s29, 0  ;;  %p1699_p8 = por %p409_p5, %p408_p3 }
  0x11   : > { %p496_p9 = scmp.lt.s32.totalorder %s1553_s23, 3 }
  0x12   : > { %s1705_s16 = scalar_select %p390_p7, %s1541_s20, %s392_s27  }
  0x13   : > { %p497_p10 = pnand %p1290_p6, %p496_p9 }
  0x14   : > { %1918 = sst [smem:[#allocation10_spill]] %s1705_s16  ;;  %p563_p11 = scmp.lt.s32.totalorder (!%p497_p10), %s1545_s21, 1 }
  0x15   : > { %500 = sbr.rel (%p497_p10) target bundleno = 1811 (0x713), region = 80  ;;  %s1919_s0 = sld [smem:[#allocation11_spill]] (!%p497_p10) }
  0x16   : > { %s1556_s22 = smov (!%p497_p10), 120   ;;  %s1557_s16 = smov (!%p497_p10), 96  }
  0x17   : > { %s1558_s24 = smov (!%p497_p10), 72   ;;  %s1559_s25 = smov (!%p497_p10), 80  }
  0x18   : > { %s1560_s26 = smov (!%p497_p10), 88   ;;  %s1561_s17 = smov (!%p497_p10), 64  }
  0x19   : > { %s1920_s1 = sld [smem:[#allocation12_spill]] (!%p497_p10) }
  0x1a   : > { %v1359_v0 = vld [vmem:[%s1893_s3 + $0x8] sm:$0xff]  ;;  %v1358_v1 = vld [vmem:[%s1893_s3] sm:$0xff]  ;;  %s1715_s29 = scalar_select %p563_p11, %s1545_s21, 1  ;;  %vm596_vm0 = vcmask 257024   ;;  %vm592_vm1 = vcmask 261120   ;;  %vm681_vm2 = vcmask 1043456  }
  0x1b   : > { %630 = vmatpush.bf16.msra.mxu0 %v1359_v0  ;;  %v1444_v5 = vld [vmem:[%s1894_s4] ss:$0 sm:$0xff]  ;;  %vm646_vm3 = vcmask 64512   ;;  %vm881_vm4 = vcmask 130048   ;;  %vm883_vm5 = vcmask 195584   ;;  %vm1071_vm10 = vcmask 523264  }
  0x1c   : > { %s1909_s27 = sshll.u32 %s1715_s29, 3  ;;  %s1922_s2 = sld [smem:[#allocation13_spill]] }
  0x1d   : > { %s566_s20 = scalar_lea.vmem %s1919_s0, %s1909_s27  ;;  %s1562_s27 = smov 104  }
  0x1e   : > { %v1723_v2 = vld [vmem:[%s566_s20] sm:$0xff]  ;;  %s1555_s20 = smov 112  }
  0x1f   : > { %631 = vmatpush.bf16.msra.mxu0 %v1358_v1  ;;  %v595_v3 = vpack.c.bf16 %v1723_v2, %v1723_v2  ;;  %s569_s0 = scalar_lea.vmem %s1920_s1, %s1715_s29 }
  0x20   : > { %v1445_v27 = vld [vmem:[%s569_s0] ss:$0 sm:$0xff]  ;;  %s1565_s0 = smov 40  }
  0x21   : > { %597 = vst.msk [vmem:[#allocation3] sm:$0xf] %vm596_vm0, %v595_v3 }
  0x28   : > { %v598_v4 = vld [vmem:[#allocation3] sm:$0xf] }
  0x29   : > { %1302 = vmatmul.msk.bf16.vlgmr.msra.gmra.mxu0 %vm592_vm1, %v598_v4 }
  0xa6   : > { %v633_v6 = vpop.f32.mrf.mxu0 }
  0xa7   : > { %v634_v7 = vadd.f32 %v1444_v5, %v633_v6 }
  0xa9   : > { %v637_v8 = vpack.c.bf16 %v634_v7, %v634_v7 }
  0xab   : > { %v642_v9 = vunpack.c.l.b16 %v637_v8 }
  0xad   : > { %v1732_v10 = vpack.c.b16 %v642_v9, %v642_v9 }
  0xae   : > { %v635_v11 = vpop.f32.mrf.mxu0 }
  0xaf   : > { %756 = vrot.lane.b32.xlu2 %v1732_v10, %s1555_s20  ;;  %700 = vrot.lane.b32.xlu1 %v1732_v10, %s1556_s22 }
  0xb0   : > { %644 = vrot.lane.b32.xlu0 %v1732_v10, %s1557_s16  ;;  %s1563_s16 = smov 56  }
  0xb7   : > { %814 = vrot.lane.b32.xlu2 %v1732_v10, %s1558_s24  ;;  %758 = vrot.lane.b32.xlu1 %v1732_v10, %s1559_s25  ;;  %s1566_s24 = smov 8   ;;  %s1567_s25 = smov 16  }
  0xb8   : > { %702 = vrot.lane.b32.xlu0 %v1732_v10, %s1560_s26  ;;  %s1568_s26 = smov 24  }
  0xbf   : > { %676 = vrot.lane.b32.xlu2 %v1732_v10, %s1561_s17 }
  0xc0   : > { %812 = vrot.lane.b32.xlu0 %v1732_v10, %s1562_s27  ;;  %s1564_s27 = smov 48  }
  0xc7   : > { %733 = vrot.lane.b32.xlu2 %v1732_v10, %s1563_s16  ;;  %s1921_s16 = sshll.u32 %s1715_s29, 3 }
 0x109   : > { %v757_v12 = vpop.permute.xlu2 %756 }
 0x111   : > { %v815_v13 = vpop.permute.xlu2 %814 }
 0x112   : > { %v820_v25 = vsel %vm646_vm3, %v815_v13, 0 }
 0x119   : > { %v677_v14 = vpop.permute.xlu2 %676 }
 0x11a   : > { %v683_v15 = vsel %vm681_vm2, %v677_v14, 0 }
 0x11b   : > { %692 = vmatpush.bf16.msra.mxu2 %v683_v15 }
 0x121   : > { %v734_v16 = vpop.permute.xlu2 %733  ;;  %v701_v17 = vpop.permute.xlu1 %700 }
 0x122   : > { %v645_v18 = vpop.permute.xlu0 %644  ;;  %v739_v19 = vsel %vm681_vm2, %v734_v16, 0 }
 0x123   : > { %v651_v20 = vsel %vm646_vm3, %v645_v18, 0  ;;  %748 = vmatpush.bf16.msrb.mxu2 %v739_v19 }
 0x124   : > { %660 = vmatpush.bf16.xpose.msra.mxu1 %v651_v20 }
 0x129   : > { %v759_v21 = vpop.permute.xlu1 %758 }
 0x12a   : > { %v703_v22 = vpop.permute.xlu0 %702  ;;  %v764_v23 = vsel %vm646_vm3, %v759_v21, 0 }
 0x12b   : > { %1303 = vmatmul.msk.bf16.vlgmr.msra.gmra.mxu1 %vm646_vm3, %v637_v8  ;;  %v708_v24 = vsel %vm646_vm3, %v703_v22, 0  ;;  %773 = vmatpush.bf16.xpose.msrb.mxu0 %v764_v23 }
 0x12c   : > { %717 = vmatpush.bf16.xpose.msra.mxu3 %v708_v24 }
 0x132   : > { %1307 = vmatmul.msk.bf16.vlgmr.msrb.gmra.mxu0 %vm646_vm3, %v757_v12  ;;  %v813_v26 = vpop.permute.xlu0 %812 }
 0x133   : > { %1305 = vmatmul.msk.bf16.vlgmr.msra.gmra.mxu3 %vm646_vm3, %v701_v17 }
 0x134   : > { %829 = vmatpush.bf16.xpose.msrb.mxu3 %v820_v25 }
 0x143   : > { %1309 = vmatmul.msk.bf16.vlgmr.msrb.gmra.mxu3 %vm646_vm3, %v813_v26  ;;  %v1361_v26 = vld [vmem:[%s1895_s5 + $0x8] sm:$0xff] }
 0x144   : > { %912 = vmatpush.bf16.msra.mxu0 %v1361_v26 }
 0x1a8   : > { %v662_v28 = vpop.f32.mrf.mxu1 }
 0x1a9   : > { %v663_v29 = vadd.f32 %v1445_v27, %v662_v28  ;;  %v1569_v28 = vmov 0.0  }
 0x1aa   : > { %593 = vst.msk [vmem:[#allocation2] sm:$0xff] %vm592_vm1, %v1569_v28 }
 0x1ab   : > { %v666_v30 = vsel %vm646_vm3, %v663_v29, -inf }
 0x1ac   : > { %667 = vmax.xlane.f32.xlu1 %v666_v30 }
 0x1af   : > { %v775_v31 = vpop.f32.mrf.mxu0 }
 0x1b0   : > { %v664_v32 = vpop.f32.mrf.mxu1  ;;  %v776_v33 = vadd.f32 %v1445_v27, %v775_v31 }
 0x1b2   : > { %v779_v34 = vsel %vm646_vm3, %v776_v33, -inf }
 0x1b3   : > { %780 = vmax.xlane.f32.xlu2 %v779_v34 }
 0x1b6   : > { %v719_v35 = vpop.f32.mrf.mxu3 }
 0x1b7   : > { %v720_v36 = vadd.f32 %v1445_v27, %v719_v35  ;;  %v777_v37 = vpop.f32.mrf.mxu0 }
 0x1b9   : > { %v723_v38 = vsel %vm646_vm3, %v720_v36, -inf }
 0x1ba   : > { %724 = vmax.xlane.f32.xlu0 %v723_v38 }
 0x1be   : > { %v721_v39 = vpop.f32.mrf.mxu3 }
 0x1bf   : > { %v885_v39 = vld [vmem:[#allocation2] sm:$0xff] }
 0x1c5   : > { %789 = vrot.lane.b32.xlu1 %v1732_v10, %s1564_s27 }
 0x1c6   : > { %v831_v40 = vpop.f32.mrf.mxu3 }
 0x1c7   : > { %v832_v41 = vadd.f32 %v1445_v27, %v831_v40  ;;  %v1360_v27 = vld [vmem:[%s1895_s5] sm:$0xff] }
 0x1c8   : > { %913 = vmatpush.bf16.msra.mxu0 %v1360_v27 }
 0x1c9   : > { %v835_v42 = vsel %vm646_vm3, %v832_v41, -inf }
 0x1ca   : > { %836 = vmax.xlane.f32.xlu0 %v835_v42  ;;  %v1446_v42 = vld [vmem:[%s1896_s6] ss:$0 sm:$0xff] }
 0x1cb   : > { %845 = vrot.lane.b32.xlu2 %v1732_v10, %s1565_s0 }
 0x1ce   : > { %v833_v43 = vpop.f32.mrf.mxu3 }
 0x21f   : > { %v668_v44 = vpop.xlane.xlu1 %667 }
 0x220   : > { %v669_v45 = vsub.f32 %v663_v29, %v668_v44 }
 0x222   : > { %v670_v46 = vmul.f32 1.442695, %v669_v45 }
 0x224   : > { %1453 = vpow2.f32 %v670_v46 }
 0x226   : > { %v781_v47 = vpop.xlane.xlu2 %780 }
 0x227   : > { %v782_v48 = vsub.f32 %v776_v33, %v781_v47 }
 0x229   : > { %v783_v49 = vmul.f32 1.442695, %v782_v48  ;;  %v1570_v48 = vmov 32.0  }
 0x22a   : > { %v1454_v50 = vpop.eup %1453 }
 0x22b   : > { %1455 = vpow2.f32 %v783_v49  ;;  %v675_v51 = vpack.c.bf16 %v1454_v50, %v1454_v50  ;;  %v672_v4 = vsel %vm646_vm3, %v1454_v50, 0.0 }
 0x22d   : > { %1304 = vmatmul.msk.bf16.vlgmr.msra.gmra.mxu2 %vm646_vm3, %v675_v51  ;;  %v725_v52 = vpop.xlane.xlu0 %724 }
 0x22e   : > { %v726_v53 = vsub.f32 %v720_v36, %v725_v52  ;;  %v846_v60 = vpop.permute.xlu2 %845 }
 0x22f   : > { %v851_v63 = vsel %vm681_vm2, %v846_v60, 0 }
 0x230   : > { %v727_v54 = vmul.f32 1.442695, %v726_v53 }
 0x231   : > { %v1456_v55 = vpop.eup %1455 }
 0x232   : > { %1457 = vpow2.f32 %v727_v54  ;;  %v785_v56 = vsel %vm646_vm3, %v1456_v55, 0.0  ;;  %v788_v7 = vpack.c.bf16 %v1456_v55, %v1456_v55 }
 0x233   : > { %786 = vadd.xlane.f32.xlu0 %v785_v56 }
 0x237   : > { %v790_v57 = vpop.permute.xlu1 %789 }
 0x238   : > { %v1458_v58 = vpop.eup %1457  ;;  %v795_v59 = vsel %vm681_vm2, %v790_v57, 0 }
 0x239   : > { %804 = vmatpush.bf16.msra.mxu2 %v795_v59  ;;  %v729_v61 = vsel %vm646_vm3, %v1458_v58, 0.0  ;;  %v732_v62 = vpack.c.bf16 %v1458_v58, %v1458_v58  ;;  %v1365_v59 = vld [vmem:[%s1899_s9 + $0x18] sm:$0xff] }
 0x23a   : > { %v1021_v60 = vsel %vm592_vm1, %v1365_v59, 0 }
 0x23b   : > { %730 = vadd.xlane.f32.xlu0 %v729_v61  ;;  %1027 = vmatpush.bf16.xpose.msrb.mxu1 %v1021_v60  ;;  %v1364_v61 = vld [vmem:[%s1899_s9 + $0x10] sm:$0xff] }
 0x23d   : > { %1306 = vmatmul.msk.bf16.vlgmr.msrb.gmra.mxu2 %vm646_vm3, %v732_v62  ;;  %v837_v0 = vpop.xlane.xlu0 %836  ;;  %v1018_v62 = vsel %vm592_vm1, %v1364_v61, 0 }
 0x23e   : > { %860 = vmatpush.bf16.msrb.mxu2 %v851_v63  ;;  %v838_v1 = vsub.f32 %v832_v41, %v837_v0  ;;  %v1363_v63 = vld [vmem:[%s1899_s9 + $0x8] sm:$0xff] }
 0x23f   : > { %v1015_v0 = vsel %vm592_vm1, %v1363_v63, 0 }
 0x240   : > { %v839_v3 = vmul.f32 1.442695, %v838_v1  ;;  %v1362_v1 = vld [vmem:[%s1899_s9] sm:$0xff] }
 0x242   : > { %1459 = vpow2.f32 %v839_v3 }
 0x243   : > { %673 = vadd.xlane.f32.xlu0 %v672_v4  ;;  %1028 = vmatpush.bf16.xpose.msrb.mxu1 %v1018_v62  ;;  %v1012_v4 = vsel %vm592_vm1, %v1362_v1, 0 }
 0x248   : > { %v1460_v5 = vpop.eup %1459 }
 0x249   : > { %v841_v6 = vsel %vm646_vm3, %v1460_v5, 0.0  ;;  %v844_v8 = vpack.c.bf16 %v1460_v5, %v1460_v5 }
 0x24a   : > { %842 = vadd.xlane.f32.xlu1 %v841_v6 }
 0x24b   : > { %1029 = vmatpush.bf16.xpose.msrb.mxu1 %v1015_v0 }
 0x24d   : > { %1308 = vmatmul.msk.bf16.vlgmr.msra.gmra.mxu2 %vm646_vm3, %v788_v7  ;;  %v1369_v7 = vld [vmem:[%s1901_s11 + $0x18] sm:$0xff] }
 0x24e   : > { %1079 = vmatpush.bf16.msra.mxu3 %v1369_v7 }
 0x253   : > { %1030 = vmatpush.bf16.xpose.msrb.mxu1 %v1012_v4 }
 0x25d   : > { %1310 = vmatmul.msk.bf16.vlgmr.msrb.gmra.mxu2 %vm646_vm3, %v844_v8  ;;  %v1368_v8 = vld [vmem:[%s1901_s11 + $0x10] sm:$0xff] }
 0x25e   : > { %1080 = vmatpush.bf16.msra.mxu3 %v1368_v8 }
 0x2a6   : > { %v787_v9 = vpop.xlane.xlu0 %786 }
 0x2ae   : > { %v731_v11 = vpop.xlane.xlu0 %730 }
 0x2af   : > { %1461 = vrcp.f32 %v731_v11  ;;  %v1367_v11 = vld [vmem:[%s1901_s11 + $0x8] sm:$0xff] }
 0x2b0   : > { %v694_v10 = vpop.f32.mrf.mxu2  ;;  %1463 = vrcp.f32 %v787_v9  ;;  %1081 = vmatpush.bf16.msra.mxu3 %v1367_v11 }
 0x2b5   : > { %v1462_v13 = vpop.eup %1461 }
 0x2b6   : > { %v1464_v17 = vpop.eup %1463  ;;  %v674_v29 = vpop.xlane.xlu0 %673 }
 0x2b8   : > { %v696_v12 = vpop.f32.mrf.mxu2 }
 0x2bd   : > { %v843_v20 = vpop.xlane.xlu1 %842 }
 0x2be   : > { %1465 = vrcp.f32 %v843_v20 }
 0x2bf   : > { %1467 = vrcp.f32 %v674_v29 }
 0x2c0   : > { %v750_v14 = vpop.f32.mrf.mxu2  ;;  %1469 = vrcp.f32 %v1570_v48 }
 0x2c1   : > { %v755_v15 = vmul.f32 %v1462_v13, %v750_v14 }
 0x2c3   : > { %869 = vrot.lane.b32.xlu2 %v755_v15, %s1566_s24  ;;  %s573_s24 = scalar_lea.vmem %s1922_s2, %s1921_s16 }
 0x2c4   : > { %v1466_v22 = vpop.eup %1465 }
 0x2c5   : > { %v1468_v31 = vpop.eup %1467 }
 0x2c6   : > { %v699_v32 = vmul.f32 %v1468_v31, %v694_v10  ;;  %v1470_v49 = vpop.eup %1469 }
 0x2c7   : > { %v936_v50 = vmul.f32 32.0, %v1470_v49  ;;  %vm940_vm6 = vweird.f32 %v1470_v49 }
 0x2c8   : > { %v752_v16 = vpop.f32.mrf.mxu2 }
 0x2c9   : > { %v937_v51 = vsub.f32 1.0, %v936_v50  ;;  %v1447_v16 = vld [vmem:[%s1897_s7] ss:$0 sm:$0xff] }
 0x2cb   : > { %v938_v52 = vmul.f32 %v1470_v49, %v937_v51 }
 0x2cd   : > { %v939_v53 = vadd.f32 %v1470_v49, %v938_v52 }
 0x2cf   : > { %v1789_v54 = vsel %vm940_vm6, %v1470_v49, %v939_v53 }
 0x2d0   : > { %v806_v18 = vpop.f32.mrf.mxu2 }
 0x2d1   : > { %v811_v19 = vmul.f32 %v1464_v17, %v806_v18  ;;  %v1448_v18 = vld [vmem:[%s1898_s8] ss:$0 sm:$0xff] }
 0x2d3   : > { %873 = vrot.lane.b32.xlu0 %v811_v19, %s1567_s25  ;;  %s560_s25 = sand.u32 1, %s1537_s19  }
 0x2d4   : > { %s1291_s29 = sshll.u32 %s560_s25, 3  ;;  %s1138_s17 = scalar_lea.sflag [#allocation5], %s560_s25 }
 0x2d5   : > { %s562_s1 = scalar_lea.vmem [#allocation4], %s1291_s29  ;;  %s1495_s29 = scalar_lea.hbm %s1905_s15, 16 }
 0x2d8   : > { %v808_v21 = vpop.f32.mrf.mxu2 }
 0x2e0   : > { %v862_v23 = vpop.f32.mrf.mxu2 }
 0x2e1   : > { %v867_v24 = vmul.f32 %v1466_v22, %v862_v23 }
 0x2e3   : > { %877 = vrot.lane.b32.xlu2 %v867_v24, %s1568_s26  ;;  %v1366_v24 = vld [vmem:[%s1901_s11] sm:$0xff]  ;;  %s1355_s26 = sshll.u32 %s1545_s21, 3  ;;  %s1150_s21 = sshll.u32 %s562_s1, 4  ;;  %s1151_s21 = int_to_ptr.vmem [resolvable:$true] %s1150_s21 }
 0x2e4   : > { %1082 = vmatpush.bf16.msra.mxu3 %v1366_v24 }
 0x2e8   : > { %v864_v25 = vpop.f32.mrf.mxu2 }
 0x2e9   : > { %v1449_v25 = vld [vmem:[%s1900_s10] ss:$0 sm:$0xff] }
 0x31d   : > { %v870_v30 = vpop.permute.xlu2 %869 }
 0x31e   : > { %v880_v33 = vsel %vm646_vm3, %v699_v32, %v870_v30 }
 0x33d   : > { %v878_v35 = vpop.permute.xlu2 %877 }
 0x345   : > { %v874_v34 = vpop.permute.xlu0 %873 }
 0x346   : > { %v882_v36 = vsel %vm881_vm4, %v880_v33, %v874_v34 }
 0x347   : > { %v884_v37 = vsel %vm883_vm5, %v882_v36, %v878_v35  ;;  %v1450_v35 = vld [vmem:[%s1902_s12] ss:$0 sm:$0xff] }
 0x348   : > { %v886_v38 = vpack.c.bf16 %v884_v37, %v884_v37 }
 0x34a   : > { %1319 = vmatmul.msk.bf16.vlgmr.msra.gmra.mxu0 %vm592_vm1, %v886_v38 }
 0x3c7   : > { %v915_v40 = vpop.f32.mrf.mxu0 }
 0x3c8   : > { %v919_v41 = vadd.f32 %v915_v40, %v885_v39  ;;  %v1571_v40 = vmov 0  }
 0x3c9   : > { %1442 = vset.pattern.permute.xlu1 %v1571_v40  ;;  %1443 = vset.pattern.permute.xlu0 %v1571_v40 }
 0x3ca   : > { %920 = vst.msk [vmem:[#allocation2] sm:$0xff] %vm592_vm1, %v919_v41 }
 0x3cf   : > { %v917_v43 = vpop.f32.mrf.mxu0 }
 0x3d1   : > { %v925_v44 = vld [vmem:[#allocation2] sm:$0xff] }
 0x3d2   : > { %v930_v45 = vadd.f32 %v1446_v42, %v925_v44  ;;  %974 = vst.msk [vmem:[#allocation2] sm:$0xff] %vm592_vm1, %v1569_v28 }
 0x3d4   : > { %v931_v46 = vadd.f32 %v930_v45, %v1723_v2 }
 0x3d6   : > { %v932_v47 = vsel %vm592_vm1, %v931_v46, 0.0 }
 0x3d7   : > { %933 = vadd.xlane.f32.xlu2 %v932_v47 }
 0x3d9   : > { %v1037_v31 = vld [vmem:[#allocation2] sm:$0xff] }
 0x44a   : > { %v934_v55 = vpop.xlane.xlu2 %933 }
 0x44b   : > { %v942_v56 = vmul.f32 %v1789_v54, %v934_v55 }
 0x44d   : > { %v943_v57 = vsub.f32 %v931_v46, %v942_v56  ;;  %v1129_v46 = vld [vmem:[%s573_s24] sm:$0xff]  ;;  %s1148_s24 = scalar_lea.hbm %s1905_s15, %s1355_s26 }
 0x44e   : > { %s1152_s2 = sshll.u32 %s1148_s24, 4  ;;  %s1153_s2 = int_to_ptr.hbm [resolvable:$true] %s1152_s2 }
 0x44f   : > { %v944_v58 = vmul.f32 %v943_v57, %v943_v57  ;;  %s1489_s20 = sshra.s32 %s1153_s2, 4  ;;  %s1490_s20 = int_to_ptr.hbm [resolvable:$true] %s1489_s20 }
 0x450   : > { %s1491_s22 = scalar_lea.hbm %s1490_s20, 8  ;;  %p1496_p1 = scmp.lt.s32.totalorder %s1490_s20, %s1905_s15 }
 0x451   : > { %v945_v2 = vsel %vm592_vm1, %v944_v58, 0.0  ;;  %p1492_p12 = scmp.ne.s32.totalorder %s1490_s20, %s1491_s22  ;;  %p1497_p2 = scmp.lt.s32.totalorder %s1495_s29, %s1491_s22 }
 0x452   : > { %946 = vadd.xlane.f32.xlu0 %v945_v2  ;;  %v1452_v2 = vld [vmem:[%s1904_s14] ss:$0 sm:$0xff] }
 0x453   : > { %p1493_p13 = pnand %p1492_p12, %p1692_p4  ;;  %p1498_p3 = por %p1497_p2, %p1496_p1 }
 0x455   : > { %p1494_p0 = pneg %p1493_p13 }
 0x457   : > { %p1499_p5 = pnand %p1498_p3, %p1494_p0 }
 0x4c5   : > { %v947_v3 = vpop.xlane.xlu0 %946 }
 0x4c6   : > { %v948_v5 = vmul.f32 %v947_v3, %v1789_v54 }
 0x4c8   : > { %v949_v6 = vadd.f32 1e-05, %v948_v5 }
 0x4ca   : > { %1471 = vrsqrt.f32 %v949_v6  ;;  %vm956_vm8 = vweird.f32 %v949_v6 }
 0x4d0   : > { %v1472_v9 = vpop.eup %1471 }
 0x4d1   : > { %v951_v10 = vmul.f32 %v1472_v9, %v949_v6  ;;  %vm957_vm7 = vweird.f32 %v1472_v9 }
 0x4d2   : > { %vm958_vm9 = vmor %vm956_vm8, %vm957_vm7 }
 0x4d3   : > { %v952_v12 = vmul.f32 %v1472_v9, %v951_v10 }
 0x4d5   : > { %v953_v13 = vmul.f32 0.5, %v952_v12 }
 0x4d7   : > { %v954_v14 = vsub.f32 1.5, %v953_v13 }
 0x4d9   : > { %v955_v15 = vmul.f32 %v1472_v9, %v954_v14 }
 0x4db   : > { %v959_v17 = vsel %vm958_vm9, %v1472_v9, %v955_v15 }
 0x4dc   : > { %v960_v19 = vmul.f32 %v959_v17, %v943_v57  ;;  %v1451_v57 = vld [vmem:[%s1903_s13] ss:$0 sm:$0xff] }
 0x4de   : > { %v965_v20 = vmul.f32 %v1447_v16, %v960_v19 }
 0x4e0   : > { %v970_v21 = vadd.f32 %v1448_v18, %v965_v20 }
 0x4e2   : > { %v971_v22 = vpack.c.bf16 %v970_v21, %v970_v21 }
 0x4e4   : > { %973 = vst.msk [vmem:[#allocation3] sm:$0xf] %vm596_vm0, %v971_v22 }
 0x4eb   : > { %v983_v23 = vld [vmem:[#allocation3] sm:$0xf] }
 0x4ec   : > { %1336 = vmatmul.msk.bf16.vlgmr.msrb.gmra.mxu1 %vm592_vm1, %v983_v23 }
 0x569   : > { %v1032_v26 = vpop.f32.mrf.mxu1 }
 0x56a   : > { %v1033_v27 = vadd.f32 %v1449_v25, %v1032_v26 }
 0x56c   : > { %v1036_v28 = vmax.f32 %v1033_v27, 0.0 }
 0x56e   : > { %v1038_v29 = vpack.c.bf16 %v1036_v28, %v1036_v28 }
 0x570   : > { %1353 = vmatmul.msk.bf16.vlgmr.msra.gmra.mxu3 %vm1071_vm10, %v1038_v29 }
 0x571   : > { %v1034_v30 = vpop.f32.mrf.mxu1 }
 0x5f3   : > { %v1084_v32 = vpop.f32.mrf.mxu3 }
 0x5f4   : > { %v1088_v33 = vadd.f32 %v1084_v32, %v1037_v31 }
 0x5f6   : > { %1089 = vst.msk [vmem:[#allocation2] sm:$0xff] %vm592_vm1, %v1088_v33 }
 0x5fb   : > { %v1086_v34 = vpop.f32.mrf.mxu3 }
 0x5fd   : > { %v1090_v36 = vld [vmem:[#allocation2] sm:$0xff] }
 0x5fe   : > { %v1091_v37 = vadd.f32 %v1090_v36, %v970_v21 }
 0x600   : > { %v1096_v38 = vadd.f32 %v1450_v35, %v1091_v37 }
 0x602   : > { %v1097_v39 = vsel %vm592_vm1, %v1096_v38, 0.0 }
 0x603   : > { %1098 = vadd.xlane.f32.xlu1 %v1097_v39 }
 0x676   : > { %v1099_v41 = vpop.xlane.xlu1 %1098 }
 0x677   : > { %v1100_v42 = vmul.f32 %v1099_v41, %v1789_v54 }
 0x679   : > { %v1101_v43 = vsub.f32 %v1096_v38, %v1100_v42 }
 0x67b   : > { %v1102_v44 = vmul.f32 %v1101_v43, %v1101_v43 }
 0x67d   : > { %v1103_v45 = vsel %vm592_vm1, %v1102_v44, 0.0 }
 0x67e   : > { %1104 = vadd.xlane.f32.xlu1 %v1103_v45 }
 0x697   : > { %1132 = vperm.xlu1 %1442, %v1129_v46  }
 0x6f1   : > { %v1105_v47 = vpop.xlane.xlu1 %1104 }
 0x6f2   : > { %v1106_v48 = vmul.f32 %v1105_v47, %v1789_v54 }
 0x6f4   : > { %v1107_v49 = vadd.f32 1e-05, %v1106_v48 }
 0x6f6   : > { %1473 = vrsqrt.f32 %v1107_v49  ;;  %vm1114_vm12 = vweird.f32 %v1107_v49 }
 0x6fc   : > { %v1474_v50 = vpop.eup %1473 }
 0x6fd   : > { %v1109_v51 = vmul.f32 %v1474_v50, %v1107_v49  ;;  %vm1115_vm11 = vweird.f32 %v1474_v50 }
 0x6fe   : > { %vm1116_vm13 = vmor %vm1114_vm12, %vm1115_vm11 }
 0x6ff   : > { %v1110_v52 = vmul.f32 %v1474_v50, %v1109_v51 }
 0x701   : > { %v1111_v53 = vmul.f32 0.5, %v1110_v52 }
 0x703   : > { %v1112_v55 = vsub.f32 1.5, %v1111_v53 }
 0x705   : > { %v1113_v56 = vmul.f32 %v1474_v50, %v1112_v55 }
 0x707   : > { %v1117_v58 = vsel %vm1116_vm13, %v1474_v50, %v1113_v56 }
 0x708   : > { %v1118_v54 = vmul.f32 %v1117_v58, %v1101_v43 }
 0x709   : > { %v1133_v60 = vpop.permute.xlu1 %1132 }
 0x70a   : > { %v1123_v59 = vmul.f32 %v1451_v57, %v1118_v54 }
 0x70c   : > { %v1128_v61 = vadd.f32 %v1452_v2, %v1123_v59 }
 0x70e   : > { %v1135_v62 = vmul.f32 %v1133_v60, %v1128_v61 }
 0x710   : > { %1136 = vst.msk [vmem:[%s562_s1] sm:$0xff] %vm592_vm1, %v1135_v62 }
 0x711   : > { %1502 = shalt.err (!%p1499_p5)
}
 0x712   : > { %1370 = dma.vmem_to_hbm [thread:$0]  (%p1692_p4), %s1151_s21, 128, %s1153_s2, %s1138_s17  }
 0x713 PF: > { %p1376_p6 = scmp.ge.s32.totalorder %s1553_s23, 2  ;;  %s1164_s1 = sand.u32 1, %s1533_s18  }
 0x714   : > { %s1165_s25 = scalar_lea.sflag [#allocation5], %s1164_s1 }
 0x715   : > { %p1373_p7 = pnand %p1376_p6, %p1699_p8 }
 0x717   : > { %p1374_p9 = pneg %p1373_p7 }
 0x719   : > { %1528 = dma.done.wait (%p1374_p9), %s1165_s25, 128  }
 0x71a   : > { %1530 = vsyncadd (%p1374_p9), %s1165_s25, 4294967168  ;;  %s28_s23 = sadd.s32 1, %s1553_s23   ;;  %s1923_s24 = sld [smem:[#allocation7_spill]] }
 0x71b   : > { %p25_p10 = scmp.ge.s32.totalorder %s28_s23, 4   ;;  %s1924_s20 = sld [smem:[#allocation10_spill]] }
 0x71c   : > { %s1925_s21 = sld [smem:[#allocation8_spill]]  ;;  %s1927_s18 = smov %s1537_s19 }
 0x71d   : > { %s1926_s22 = sld [smem:[#allocation9_spill]]  ;;  %27 = sbr.rel (!%p25_p10) target bundleno = 8 (0x8), region = 138 }
 0x720   : > { %s1928_s19 = smov %s1923_s24 }
 0x722   :  { %1171 = vsyncpa [#allocation5], 1 }
 0x723   :  { %1173 = vsyncpa [#allocation5 + $0x1], 1 }

</bundles_post_ra>
